<compile_context>
chip_gen: v6e
topology: v6e:2x2x1
jax: 0.10.0
libtpu: 0.0.40
codegen_flags: <defaults>
</compile_context>

<pallas_src>
import functools
import math

import jax
import jax.numpy as jnp
from jax.experimental import pallas as pl
from jax.experimental.pallas import tpu as pltpu


# --------------------------------------------------------------------------------------
# Pallas kernels
# --------------------------------------------------------------------------------------
def _filter_kernel_learnable(x_ref, base_ref, learn_ref, o_ref, *, inv_ft_num):
    # norm_sigma(l) = 2*sigmoid(l) - 1  (EUP exp + VPU elementwise)
    l = learn_ref[...]
    filt = base_ref[...] + (2.0 / (1.0 + jnp.exp(-l)) - 1.0)
    if inv_ft_num != 1.0:                      # trace-time constant fold
        filt = filt * inv_ft_num
    o_ref[...] = x_ref[...] * filt             # broadcast (1, SS) * (TR, SS)


def _filter_kernel_fixed(x_ref, base_ref, o_ref, *, inv_ft_num):
    filt = base_ref[...]
    if inv_ft_num != 1.0:
        filt = filt * inv_ft_num
    o_ref[...] = x_ref[...] * filt


def _pick_row_tile(rows):
    # Block last-2 dims must be divisible by (8, 128) OR equal the full array dims.
    if rows % 8 != 0 or rows <= 256:
        return rows                            # full-extent block: always legal
    for tr in (256, 128, 64, 32, 16, 8):
        if rows % tr == 0:
            return tr
    return rows


# --------------------------------------------------------------------------------------
# Wrapper
# --------------------------------------------------------------------------------------
def filter_forward(x, base, learnable, *, use_learnable=True, norm=False, ft_num=1.0):
    """Pallas implementation of Filter.forward.

    x:         (..., S, S) float32
    base:      (S, S) float32 fixed band mask (non-learnable buffer)
    learnable: (S, S) float32 (ignored when use_learnable=False)
    """
    S = base.shape[-1]
    assert x.shape[-2:] == (S, S), (x.shape, S)
    lead = x.shape[:-2]
    R = int(math.prod(lead)) if lead else 1
    SS = S * S

    # Lane-dense flattening: rows = batch*channel on sublanes, S*S on lanes.
    xf = x.reshape(R, SS).astype(jnp.float32)
    base_f = base.reshape(1, SS).astype(jnp.float32)
    inv = (1.0 / float(ft_num)) if norm else 1.0

    TR = _pick_row_tile(R)
    grid = (R // TR,)

    row_spec = pl.BlockSpec((TR, SS), lambda i: (i, 0))
    bcast_spec = pl.BlockSpec((1, SS), lambda i: (0, 0))

    if use_learnable:
        kernel = functools.partial(_filter_kernel_learnable, inv_ft_num=inv)
        in_specs = [row_spec, bcast_spec, bcast_spec]
        args = (xf, base_f, learnable.reshape(1, SS).astype(jnp.float32))
    else:
        kernel = functools.partial(_filter_kernel_fixed, inv_ft_num=inv)
        in_specs = [row_spec, bcast_spec]
        args = (xf, base_f)

    out = pl.pallas_call(
        kernel,
        out_shape=jax.ShapeDtypeStruct((R, SS), jnp.float32),
        grid=grid,
        in_specs=in_specs,
        out_specs=row_spec,
        compiler_params=pltpu.CompilerParams(dimension_semantics=("parallel",)),
    )(*args)

    return out.reshape(x.shape)


# --------------------------------------------------------------------------------------
# Parameter construction + pure-JAX reference
# --------------------------------------------------------------------------------------
def generate_filter(start, end, size):
    return [[0.0 if i + j > end or i + j <= start else 1.0 for j in range(size)]
            for i in range(size)]


def init_filter_params(key, size, band_start, band_end):
    base_rows = generate_filter(band_start, band_end, size)
    base = jnp.asarray(base_rows, dtype=jnp.float32)
    ft_num = float(sum(sum(r) for r in base_rows))              # static buffer -> python const
    learnable = 0.1 * jax.random.normal(key, (size, size), jnp.float32)  # ~ .normal_(0, 0.1)
    return base, learnable, ft_num


def filter_reference(x, base, learnable, *, use_learnable=True, norm=False, ft_num=1.0):
    filt = base + (2.0 * jax.nn.sigmoid(learnable) - 1.0) if use_learnable else base
    y = x * filt
    if norm:
        y = y / ft_num
    return y


# --------------------------------------------------------------------------------------
if __name__ == "__main__":
    key = jax.random.PRNGKey(0)
    pkey, xkey = jax.random.split(key)

    size = 16
    base, learnable, ft_num = init_filter_params(pkey, size, band_start=0, band_end=size // 2)

    # Small input consistent with the module: NCHW feature map with H = W = size.
    x = jax.random.normal(xkey, (2, 4, size, size), jnp.float32)

    # Default config: use_learnable=True, norm=False.
    fwd = jax.jit(functools.partial(filter_forward,
                                    use_learnable=True, norm=False, ft_num=ft_num))
    out = jax.block_until_ready(fwd(x, base, learnable))
    ref = filter_reference(x, base, learnable, use_learnable=True, norm=False, ft_num=ft_num)
    assert out.shape == x.shape, out.shape
    assert bool(jnp.all(jnp.isfinite(out)))
    assert bool(jnp.allclose(out, ref, atol=1e-5, rtol=1e-5))

    # Also exercise the fixed-filter + norm path.
    fwd2 = jax.jit(functools.partial(filter_forward,
                                     use_learnable=False, norm=True, ft_num=ft_num))
    out2 = jax.block_until_ready(fwd2(x, base, learnable))
    ref2 = filter_reference(x, base, learnable, use_learnable=False, norm=True, ft_num=ft_num)
    assert bool(jnp.allclose(out2, ref2, atol=1e-5, rtol=1e-5))

    print("KERNEL_OK")
</pallas_src>

<mosaic_0001>
module attributes {stable_mosaic.version = 11 : i64} {
  func.func @_filter_kernel_learnable(%arg0: i32, %arg1: memref<8x256xf32, #tpu.memory_space<vmem>>, %arg2: memref<1x256xf32, #tpu.memory_space<vmem>>, %arg3: memref<1x256xf32, #tpu.memory_space<vmem>>, %arg4: memref<8x256xf32, #tpu.memory_space<vmem>>) attributes {dimension_semantics = [#tpu.dimension_semantics<parallel>], iteration_bounds = array<i64: 1>, scalar_prefetch = 0 : i64, scratch_operands = 0 : i64, tpu.core_type = #tpu.core_type<tc>, window_params = [{transform_indices = @transform_0, window_bounds = array<i64: 8, 256>}, {pipeline_mode = #tpu.pipeline_mode<synchronous>, transform_indices = @transform_1, window_bounds = array<i64: 1, 256>}, {pipeline_mode = #tpu.pipeline_mode<synchronous>, transform_indices = @transform_2, window_bounds = array<i64: 1, 256>}, {transform_indices = @transform_3, window_bounds = array<i64: 8, 256>}]} {
    %c0 = arith.constant 0 : index
    %c0_0 = arith.constant 0 : index
    %0 = vector.load %arg3[%c0, %c0_0] : memref<1x256xf32, #tpu.memory_space<vmem>>, vector<1x256xf32>
    %c0_1 = arith.constant 0 : index
    %c0_2 = arith.constant 0 : index
    %1 = vector.load %arg2[%c0_1, %c0_2] : memref<1x256xf32, #tpu.memory_space<vmem>>, vector<1x256xf32>
    %cst = arith.constant 0.000000e+00 : f32
    %2 = vector.broadcast %cst : f32 to vector<1x256xf32>
    %3 = arith.subf %2, %0 : vector<1x256xf32>
    %4 = math.exp %3 : vector<1x256xf32>
    %cst_3 = arith.constant 1.000000e+00 : f32
    %5 = vector.broadcast %cst_3 : f32 to vector<1x256xf32>
    %6 = arith.addf %5, %4 : vector<1x256xf32>
    %cst_4 = arith.constant 2.000000e+00 : f32
    %7 = vector.broadcast %cst_4 : f32 to vector<1x256xf32>
    %8 = arith.divf %7, %6 : vector<1x256xf32>
    %cst_5 = arith.constant 1.000000e+00 : f32
    %9 = vector.broadcast %cst_5 : f32 to vector<1x256xf32>
    %10 = arith.subf %8, %9 : vector<1x256xf32>
    %11 = arith.addf %1, %10 : vector<1x256xf32>
    %c0_6 = arith.constant 0 : index
    %c0_7 = arith.constant 0 : index
    %12 = vector.load %arg1[%c0_6, %c0_7] : memref<8x256xf32, #tpu.memory_space<vmem>>, vector<8x256xf32>
    %13 = vector.broadcast %11 : vector<1x256xf32> to vector<8x256xf32>
    %14 = arith.mulf %12, %13 : vector<8x256xf32>
    %c0_8 = arith.constant 0 : index
    %c0_9 = arith.constant 0 : index
    %15 = vector.load %arg4[%c0_8, %c0_9] : memref<8x256xf32, #tpu.memory_space<vmem>>, vector<8x256xf32>
    tpu.vector_store %arg4[%c0_8, %c0_9], %14 {strides = array<i32>} : memref<8x256xf32, #tpu.memory_space<vmem>>, vector<8x256xf32>,
    return
  }
  func.func @transform_0(%arg0: i32) -> (i32, i32) {
    %c0_i32 = arith.constant 0 : i32
    %c0_i32_0 = arith.constant 0 : i32
    return %arg0, %c0_i32 : i32, i32
  }
  func.func @transform_1(%arg0: i32) -> (i32, i32) {
    %c0_i32 = arith.constant 0 : i32
    %c0_i32_0 = arith.constant 0 : i32
    %c0_i32_1 = arith.constant 0 : i32
    return %c0_i32, %c0_i32_0 : i32, i32
  }
  func.func @transform_2(%arg0: i32) -> (i32, i32) {
    %c0_i32 = arith.constant 0 : i32
    %c0_i32_0 = arith.constant 0 : i32
    %c0_i32_1 = arith.constant 0 : i32
    return %c0_i32, %c0_i32_0 : i32, i32
  }
  func.func @transform_3(%arg0: i32) -> (i32, i32) {
    %c0_i32 = arith.constant 0 : i32
    %c0_i32_0 = arith.constant 0 : i32
    return %arg0, %c0_i32 : i32, i32
  }
}

</mosaic_0001>

<bundles_post_ra>
// kernel: filter_forward.1
= control target key start
LH: loop header
LB: loop body
LE: loop exit
PB: predicated region body
PF: predicated region fallthrough
CT: control target
= control target key end

     0   :  { %v27_v5 = vlaneseq  ;;  %s88_s2 = inlined_call_operand.vmem [shape: f32[1,256], index: 2, kind: input, shape index: {}]   ;;  %s89_s1 = inlined_call_operand.vmem [shape: f32[1,256], index: 1, kind: input, shape index: {}]   ;;  %s90_s0 = inlined_call_operand.vmem [shape: f32[8,256], index: 0, kind: input, shape index: {}]   ;;  %s91_s3 = inlined_call_operand.vmem [shape: f32[8,256], index: 3, kind: output, shape index: {}]  }
   0x1   :  { %v14_v0 = vld [vmem:[%s88_s2] sm:$0x3]  ;;  %v25_v15 = vld [vmem:[%s90_s0 + $0x8] sm:$0xff] }
   0x2   :  { %v16_v1 = vsub.f32 0.0, %v14_v0  ;;  %v28_v6 = vshrl.u32 %v27_v5, 7  ;;  %v15_v9 = vld [vmem:[%s89_s1] sm:$0x3] }
   0x3   :  { %v24_v14 = vld [vmem:[%s90_s0] sm:$0xff] }
   0x4   :  { %v17_v2 = vmul.f32 1.442695, %v16_v1  ;;  %v29_v11 = vsub.s32 0, %v28_v6  ;;  %v33_v12 = vsub.s32 1, %v28_v6 }
   0x6   :  { %46 = vpow2.f32 %v17_v2 }
  0x13   :  { %v47_v3 = vpop.eup %46 }
  0x14   :  { %v19_v4 = vadd.f32 1.0, %v47_v3 }
  0x16   :  { %48 = vrcp.f32 %v19_v4 }
  0x23   :  { %v49_v7 = vpop.eup %48 }
  0x24   :  { %v21_v8 = vmul.f32 2.0, %v49_v7 }
  0x26   :  { %v45_v10 = vadd.f32 -1.0, %v21_v8 }
  0x28   :  { %v23_v13 = vadd.f32 %v45_v10, %v15_v9 }
  0x2a   :  { %v30_v16 = vrot.slane %v23_v13, %v29_v11  ;;  %v34_v17 = vrot.slane %v23_v13, %v33_v12 }
  0x2c   :  { %v37_v18 = vmul.f32 %v30_v16, %v24_v14  ;;  %v38_v19 = vmul.f32 %v34_v17, %v25_v15 }
  0x2e   :  { %39 = vst [vmem:[%s91_s3] sm:$0xff] %v37_v18  ;;  %40 = vst [vmem:[%s91_s3 + $0x8] sm:$0xff] %v38_v19 }

</bundles_post_ra>
